<compile_context>
chip_gen: v7x
topology: tpu7x:2x2x1
jax: 0.10.0
libtpu: 0.0.40
codegen_flags: <defaults>
</compile_context>

<pallas_src>
import jax
import jax.numpy as jnp
from jax.experimental import pallas as pl
from jax.experimental.pallas import tpu as pltpu


def _gated_fusion_kernel(x2_ref, x3_ref, x4_ref,
                         w1row2_ref, w1row3_ref, w1row4_ref,
                         w2t_ref, e_ref, et_ref, o_ref):
    # x*_ref / o_ref: (bt*C, HWp) in the native I/O dtype.
    # w1row*_ref:     (bt*C, hidden) f32, row-expanded W1^T with 1/HW folded in.
    # w2t_ref:        (hidden, 3) f32.
    # e_ref:          (bt, bt*C) f32 batch-segment selector; et_ref = E^T.
    f32 = jnp.float32

    # Per-row spatial sums (lane reduction), accumulated in f32: (bt*C, 1).
    # Casts are fused per-use; no long-lived f32 copies of the blocks.
    s2 = jnp.sum(x2_ref[...].astype(f32), axis=1, keepdims=True)
    s3 = jnp.sum(x3_ref[...].astype(f32), axis=1, keepdims=True)
    s4 = jnp.sum(x4_ref[...].astype(f32), axis=1, keepdims=True)

    # First MLP layer without any in-kernel reshape:
    #   h[b, j] = sum_{rows r of batch b} s*(r) * W1row*(r, j)   (1/HW folded in)
    contrib = (s2 * w1row2_ref[...]
               + s3 * w1row3_ref[...]
               + s4 * w1row4_ref[...])                              # (bt*C, hidden)
    h = jnp.dot(e_ref[...], contrib, preferred_element_type=f32)    # (bt, hidden)
    h = jnp.maximum(h, 0.0)
    logits = jnp.dot(h, w2t_ref[...], preferred_element_type=f32)   # (bt, 3)
    alpha = jax.nn.sigmoid(logits)                                   # EUP

    # Broadcast alpha back onto rows: (bt*C, 3).
    arow = jnp.dot(et_ref[...], alpha, preferred_element_type=f32)
    a2 = arow[:, 0:1]
    a3 = arow[:, 1:2]
    a4 = arow[:, 2:3]

    # Weighted sum in f32, stored in the native I/O dtype.
    o_ref[...] = (a2 * x2_ref[...].astype(f32)
                  + a3 * x3_ref[...].astype(f32)
                  + a4 * x4_ref[...].astype(f32)).astype(o_ref.dtype)


def _vmem_budget_and_cap():
    """Generation-aware VMEM budgeting (64 MiB/TC on v7x vs 128 MiB on v5e/v6e)."""
    try:
        phys = pltpu.get_tpu_info().vmem_capacity_bytes
    except Exception:      # query unavailable -> assume the smallest (v7x)
        phys = 64 << 20
    budget = min(40 << 20, max(8 << 20, phys // 2 - (8 << 20)))
    cap = max(32 << 20, phys - (8 << 20))      # headroom for compiler scratch
    return budget, cap


def _pick_batch_block(B, C, per_batch_bytes, vmem_budget_bytes, min_steps=8):
    """How many batches to pack per grid step.

    * bt divides B and (bt*C) % 8 == 0 (sublane-aligned block), or bt == B.
    * Double-buffered working set (3 inputs + 1 output) fits the VMEM budget.
    * Prefer the smallest roofline-sized (~2 MiB/input) block so the grid keeps
      >= min_steps steps (pipelining + sharding across v7x's two TensorCores),
      instead of the VMEM-maximal block.
    * Prefer an even grid-step count when possible (v7x dual TC).
    """
    valid = [d for d in range(1, B + 1)
             if B % d == 0 and ((d * C) % 8 == 0 or d == B)]
    fitting = [d for d in valid if 8 * d * per_batch_bytes <= vmem_budget_bytes]
    # TODO(synk): if even the smallest legal block overflows VMEM (huge C*HW
    # single batch on v7x's 64 MiB), add a two-sweep spatial-split fallback.
    cands = fitting if fitting else valid[:1]

    roofline = [d for d in cands if d * per_batch_bytes >= (2 << 20)]
    if roofline:
        bt = roofline[0]                                  # smallest roofline block
    else:
        with_steps = [d for d in cands if B // d >= min_steps]
        bt = with_steps[-1] if with_steps else cands[-1]

    steps = B // bt
    if steps > 1 and steps % 2:
        even = [d for d in cands if d < bt and (B // d) % 2 == 0]
        if even:
            bt = even[-1]                                 # largest block, even steps
    return bt


def gated_fusion(x2, x3, x4, w1, w2):
    """GatedFusion forward.

    x2, x3, x4: (B, C, H, W) activations (native dtype kept for HBM I/O).
    w1: (hidden, 3*C), w2: (3, hidden)  -- PyTorch nn.Linear weight layout.
    All in-kernel arithmetic is float32.
    """
    B, C, H, W = x2.shape
    HW = H * W
    dtype = jnp.dtype(x2.dtype)
    itemsize = dtype.itemsize

    # Flatten to a sublane- and lane-dense (B*C, HW) slab. Pad the lane dim to
    # a multiple of 128 only when needed (zero pad -> pooled sums unaffected,
    # padded lanes are sliced off afterwards).
    HWp = -(-HW // 128) * 128

    def _flat(x):
        xf = x.reshape(B * C, HW)
        if HWp != HW:
            xf = jnp.pad(xf, ((0, 0), (0, HWp - HW)))
        return xf

    x2f, x3f, x4f = _flat(x2), _flat(x3), _flat(x4)

    per_batch_bytes = C * HWp * itemsize
    vmem_budget, vmem_cap = _vmem_budget_and_cap()
    bt = _pick_batch_block(B, C, per_batch_bytes, vmem_budget)
    steps = B // bt
    btC = bt * C

    # Host-side weight prep (f32, done once): transpose & split W1, fold in the
    # 1/HW mean scale, row-expand so the first layer needs no in-kernel reshape,
    # and build the batch-segment selector E (E[b, r] = 1 iff row r is batch b).
    inv_hw = jnp.float32(1.0 / HW)
    w1t = jnp.asarray(w1, jnp.float32).T * inv_hw            # (3C, hidden)
    w1row2 = jnp.tile(w1t[:C], (bt, 1))                      # (btC, hidden)
    w1row3 = jnp.tile(w1t[C:2 * C], (bt, 1))
    w1row4 = jnp.tile(w1t[2 * C:], (bt, 1))
    w2t = jnp.asarray(w2, jnp.float32).T                     # (hidden, 3)
    e_mat = jnp.repeat(jnp.eye(bt, dtype=jnp.float32), C, axis=1)   # (bt, btC)
    et_mat = e_mat.T                                          # (btC, bt)

    x_spec = pl.BlockSpec((btC, HWp), lambda b: (b, 0))

    def w_spec(a):
        return pl.BlockSpec(a.shape, lambda b: (0, 0))

    weight_bytes = 4 * (3 * w1row2.size + w2t.size + e_mat.size + et_mat.size)
    block_bytes = btC * HWp * itemsize
    needed = 2 * 4 * block_bytes + weight_bytes + (2 << 20)   # dbl-buffered 3in+1out
    vmem_limit = int(min(max(needed, 32 << 20), vmem_cap))

    cost = pl.CostEstimate(
        flops=8 * B * C * HW,                    # pooling + weighted sum (tiny)
        transcendentals=4 * B,                   # sigmoid
        bytes_accessed=4 * B * C * HWp * itemsize + weight_bytes)

    out = pl.pallas_call(
        _gated_fusion_kernel,
        out_shape=jax.ShapeDtypeStruct((B * C, HWp), dtype),
        grid_spec=pltpu.PrefetchScalarGridSpec(
            num_scalar_prefetch=0,
            grid=(steps,),
            in_specs=[x_spec, x_spec, x_spec,
                      w_spec(w1row2), w_spec(w1row3), w_spec(w1row4),
                      w_spec(w2t), w_spec(e_mat), w_spec(et_mat)],
            out_specs=x_spec,
        ),
        compiler_params=pltpu.CompilerParams(
            dimension_semantics=("parallel",),
            vmem_limit_bytes=vmem_limit,
        ),
        cost_estimate=cost,
    )(x2f, x3f, x4f, w1row2, w1row3, w1row4, w2t, e_mat, et_mat)

    if HWp != HW:
        out = out[:, :HW]
    return out.reshape(B, C, H, W)


def _reference(x2, x3, x4, w1, w2):
    # Pure-JAX reference of the PyTorch forward, for verification.
    B = x2.shape[0]
    p2 = jnp.mean(x2, axis=(2, 3))
    p3 = jnp.mean(x3, axis=(2, 3))
    p4 = jnp.mean(x4, axis=(2, 3))
    x_cat = jnp.concatenate([p2, p3, p4], axis=1)          # (B, 3C)
    h = jnp.maximum(x_cat @ w1.T, 0.0)                     # (B, hidden)
    alpha = jax.nn.sigmoid(h @ w2.T)                       # (B, 3)
    a2 = alpha[:, 0].reshape(B, 1, 1, 1)
    a3 = alpha[:, 1].reshape(B, 1, 1, 1)
    a4 = alpha[:, 2].reshape(B, 1, 1, 1)
    return a2 * x2 + a3 * x3 + a4 * x4


if __name__ == "__main__":
    B, C, H, W = 2, 4, 16, 16
    hidden = C // 2

    key = jax.random.PRNGKey(0)
    k1, k2, k3, k4, k5 = jax.random.split(key, 5)
    x2 = jax.random.normal(k1, (B, C, H, W), dtype=jnp.float32)
    x3 = jax.random.normal(k2, (B, C, H, W), dtype=jnp.float32)
    x4 = jax.random.normal(k3, (B, C, H, W), dtype=jnp.float32)

    # Deterministic parameters (nn.Linear weight layout: (out_features, in_features)).
    w1 = 0.1 * jax.random.normal(k4, (hidden, 3 * C), dtype=jnp.float32)
    w2 = 0.1 * jax.random.normal(k5, (3, hidden), dtype=jnp.float32)

    ref = _reference(x2, x3, x4, w1, w2)

    out = gated_fusion(x2, x3, x4, w1, w2)
    jax.block_until_ready(out)
    assert out.shape == (B, C, H, W)
    assert out.dtype == jnp.float32
    assert jnp.allclose(out, ref, atol=1e-5, rtol=1e-5), "mismatch vs reference"

    print("KERNEL_OK")
</pallas_src>

<mosaic_0001>
module attributes {stable_mosaic.version = 11 : i64} {
  func.func @_gated_fusion_kernel(%arg0: i32, %arg1: memref<8x256xf32, #tpu.memory_space<vmem>>, %arg2: memref<8x256xf32, #tpu.memory_space<vmem>>, %arg3: memref<8x256xf32, #tpu.memory_space<vmem>>, %arg4: memref<8x2xf32, #tpu.memory_space<vmem>>, %arg5: memref<8x2xf32, #tpu.memory_space<vmem>>, %arg6: memref<8x2xf32, #tpu.memory_space<vmem>>, %arg7: memref<2x3xf32, #tpu.memory_space<vmem>>, %arg8: memref<2x8xf32, #tpu.memory_space<vmem>>, %arg9: memref<8x2xf32, #tpu.memory_space<vmem>>, %arg10: memref<8x256xf32, #tpu.memory_space<vmem>>) attributes {dimension_semantics = [#tpu.dimension_semantics<parallel>], iteration_bounds = array<i64: 1>, scalar_prefetch = 0 : i64, scratch_operands = 0 : i64, tpu.core_type = #tpu.core_type<tc>, window_params = [{transform_indices = @transform_0, window_bounds = array<i64: 8, 256>}, {transform_indices = @transform_1, window_bounds = array<i64: 8, 256>}, {transform_indices = @transform_2, window_bounds = array<i64: 8, 256>}, {pipeline_mode = #tpu.pipeline_mode<synchronous>, transform_indices = @transform_3, window_bounds = array<i64: 8, 2>}, {pipeline_mode = #tpu.pipeline_mode<synchronous>, transform_indices = @transform_4, window_bounds = array<i64: 8, 2>}, {pipeline_mode = #tpu.pipeline_mode<synchronous>, transform_indices = @transform_5, window_bounds = array<i64: 8, 2>}, {pipeline_mode = #tpu.pipeline_mode<synchronous>, transform_indices = @transform_6, window_bounds = array<i64: 2, 3>}, {pipeline_mode = #tpu.pipeline_mode<synchronous>, transform_indices = @transform_7, window_bounds = array<i64: 2, 8>}, {pipeline_mode = #tpu.pipeline_mode<synchronous>, transform_indices = @transform_8, window_bounds = array<i64: 8, 2>}, {transform_indices = @transform_9, window_bounds = array<i64: 8, 256>}]} {
    %c0 = arith.constant 0 : index
    %c0_0 = arith.constant 0 : index
    %0 = vector.load %arg1[%c0, %c0_0] : memref<8x256xf32, #tpu.memory_space<vmem>>, vector<8x256xf32>
    %cst = arith.constant dense<0.000000e+00> : vector<8xf32>
    %1 = vector.multi_reduction <add>, %0, %cst [1] : vector<8x256xf32> to vector<8xf32>
    %2 = vector.shape_cast %1 : vector<8xf32> to vector<8x1xf32>
    %c0_1 = arith.constant 0 : index
    %c0_2 = arith.constant 0 : index
    %3 = vector.load %arg2[%c0_1, %c0_2] : memref<8x256xf32, #tpu.memory_space<vmem>>, vector<8x256xf32>
    %cst_3 = arith.constant dense<0.000000e+00> : vector<8xf32>
    %4 = vector.multi_reduction <add>, %3, %cst_3 [1] : vector<8x256xf32> to vector<8xf32>
    %5 = vector.shape_cast %4 : vector<8xf32> to vector<8x1xf32>
    %c0_4 = arith.constant 0 : index
    %c0_5 = arith.constant 0 : index
    %6 = vector.load %arg3[%c0_4, %c0_5] : memref<8x256xf32, #tpu.memory_space<vmem>>, vector<8x256xf32>
    %cst_6 = arith.constant dense<0.000000e+00> : vector<8xf32>
    %7 = vector.multi_reduction <add>, %6, %cst_6 [1] : vector<8x256xf32> to vector<8xf32>
    %8 = vector.shape_cast %7 : vector<8xf32> to vector<8x1xf32>
    %c0_7 = arith.constant 0 : index
    %c0_8 = arith.constant 0 : index
    %9 = vector.load %arg4[%c0_7, %c0_8] : memref<8x2xf32, #tpu.memory_space<vmem>>, vector<8x2xf32>
    %10 = vector.broadcast %2 : vector<8x1xf32> to vector<8x2xf32>
    %11 = arith.mulf %10, %9 : vector<8x2xf32>
    %c0_9 = arith.constant 0 : index
    %c0_10 = arith.constant 0 : index
    %12 = vector.load %arg5[%c0_9, %c0_10] : memref<8x2xf32, #tpu.memory_space<vmem>>, vector<8x2xf32>
    %13 = vector.broadcast %5 : vector<8x1xf32> to vector<8x2xf32>
    %14 = arith.mulf %13, %12 : vector<8x2xf32>
    %15 = arith.addf %11, %14 : vector<8x2xf32>
    %c0_11 = arith.constant 0 : index
    %c0_12 = arith.constant 0 : index
    %16 = vector.load %arg6[%c0_11, %c0_12] : memref<8x2xf32, #tpu.memory_space<vmem>>, vector<8x2xf32>
    %17 = vector.broadcast %8 : vector<8x1xf32> to vector<8x2xf32>
    %18 = arith.mulf %17, %16 : vector<8x2xf32>
    %19 = arith.addf %15, %18 : vector<8x2xf32>
    %c0_13 = arith.constant 0 : index
    %c0_14 = arith.constant 0 : index
    %20 = vector.load %arg8[%c0_13, %c0_14] : memref<2x8xf32, #tpu.memory_space<vmem>>, vector<2x8xf32>
    %cst_15 = arith.constant dense<0.000000e+00> : vector<2x2xf32>
    %21 = tpu.matmul %20, %19, %cst_15 {dimension_numbers = #tpu.dot_dimension_numbers<[1], [0], [0], [1], [0, 0, 1, 1], [], []>} : vector<2x8xf32>, vector<8x2xf32>, vector<2x2xf32> -> vector<2x2xf32>
    %cst_16 = arith.constant 0.000000e+00 : f32
    %22 = vector.broadcast %cst_16 : f32 to vector<2x2xf32>
    %23 = arith.maximumf %21, %22 : vector<2x2xf32>
    %c0_17 = arith.constant 0 : index
    %c0_18 = arith.constant 0 : index
    %24 = vector.load %arg7[%c0_17, %c0_18] : memref<2x3xf32, #tpu.memory_space<vmem>>, vector<2x3xf32>
    %cst_19 = arith.constant dense<0.000000e+00> : vector<2x3xf32>
    %25 = tpu.matmul %23, %24, %cst_19 {dimension_numbers = #tpu.dot_dimension_numbers<[1], [0], [0], [1], [0, 0, 1, 1], [], []>} : vector<2x2xf32>, vector<2x3xf32>, vector<2x3xf32> -> vector<2x3xf32>
    %26 = arith.negf %25 : vector<2x3xf32>
    %27 = math.exp %26 : vector<2x3xf32>
    %cst_20 = arith.constant 1.000000e+00 : f32
    %28 = vector.broadcast %cst_20 : f32 to vector<2x3xf32>
    %29 = arith.addf %28, %27 : vector<2x3xf32>
    %30 = arith.divf %28, %29 : vector<2x3xf32>
    %c0_21 = arith.constant 0 : index
    %c0_22 = arith.constant 0 : index
    %31 = vector.load %arg9[%c0_21, %c0_22] : memref<8x2xf32, #tpu.memory_space<vmem>>, vector<8x2xf32>
    %cst_23 = arith.constant dense<0.000000e+00> : vector<8x3xf32>
    %32 = tpu.matmul %31, %30, %cst_23 {dimension_numbers = #tpu.dot_dimension_numbers<[1], [0], [0], [1], [0, 0, 1, 1], [], []>} : vector<8x2xf32>, vector<2x3xf32>, vector<8x3xf32> -> vector<8x3xf32>
    %33 = vector.extract_strided_slice %32 {offsets = [0, 0], sizes = [8, 1], strides = [1, 1]} : vector<8x3xf32> to vector<8x1xf32>
    %34 = vector.extract_strided_slice %32 {offsets = [0, 1], sizes = [8, 1], strides = [1, 1]} : vector<8x3xf32> to vector<8x1xf32>
    %35 = vector.extract_strided_slice %32 {offsets = [0, 2], sizes = [8, 1], strides = [1, 1]} : vector<8x3xf32> to vector<8x1xf32>
    %c0_24 = arith.constant 0 : index
    %c0_25 = arith.constant 0 : index
    %36 = vector.load %arg1[%c0_24, %c0_25] : memref<8x256xf32, #tpu.memory_space<vmem>>, vector<8x256xf32>
    %37 = vector.broadcast %33 : vector<8x1xf32> to vector<8x256xf32>
    %38 = arith.mulf %37, %36 : vector<8x256xf32>
    %c0_26 = arith.constant 0 : index
    %c0_27 = arith.constant 0 : index
    %39 = vector.load %arg2[%c0_26, %c0_27] : memref<8x256xf32, #tpu.memory_space<vmem>>, vector<8x256xf32>
    %40 = vector.broadcast %34 : vector<8x1xf32> to vector<8x256xf32>
    %41 = arith.mulf %40, %39 : vector<8x256xf32>
    %42 = arith.addf %38, %41 : vector<8x256xf32>
    %c0_28 = arith.constant 0 : index
    %c0_29 = arith.constant 0 : index
    %43 = vector.load %arg3[%c0_28, %c0_29] : memref<8x256xf32, #tpu.memory_space<vmem>>, vector<8x256xf32>
    %44 = vector.broadcast %35 : vector<8x1xf32> to vector<8x256xf32>
    %45 = arith.mulf %44, %43 : vector<8x256xf32>
    %46 = arith.addf %42, %45 : vector<8x256xf32>
    %c0_30 = arith.constant 0 : index
    %c0_31 = arith.constant 0 : index
    %47 = vector.load %arg10[%c0_30, %c0_31] : memref<8x256xf32, #tpu.memory_space<vmem>>, vector<8x256xf32>
    tpu.vector_store %arg10[%c0_30, %c0_31], %46 {strides = array<i32>} : memref<8x256xf32, #tpu.memory_space<vmem>>, vector<8x256xf32>,
    return
  }
  func.func @transform_0(%arg0: i32) -> (i32, i32) {
    %c0_i32 = arith.constant 0 : i32
    %c0_i32_0 = arith.constant 0 : i32
    return %arg0, %c0_i32 : i32, i32
  }
  func.func @transform_1(%arg0: i32) -> (i32, i32) {
    %c0_i32 = arith.constant 0 : i32
    %c0_i32_0 = arith.constant 0 : i32
    return %arg0, %c0_i32 : i32, i32
  }
  func.func @transform_2(%arg0: i32) -> (i32, i32) {
    %c0_i32 = arith.constant 0 : i32
    %c0_i32_0 = arith.constant 0 : i32
    return %arg0, %c0_i32 : i32, i32
  }
  func.func @transform_3(%arg0: i32) -> (i32, i32) {
    %c0_i32 = arith.constant 0 : i32
    %c0_i32_0 = arith.constant 0 : i32
    %c0_i32_1 = arith.constant 0 : i32
    return %c0_i32, %c0_i32_0 : i32, i32
  }
  func.func @transform_4(%arg0: i32) -> (i32, i32) {
    %c0_i32 = arith.constant 0 : i32
    %c0_i32_0 = arith.constant 0 : i32
    %c0_i32_1 = arith.constant 0 : i32
    return %c0_i32, %c0_i32_0 : i32, i32
  }
  func.func @transform_5(%arg0: i32) -> (i32, i32) {
    %c0_i32 = arith.constant 0 : i32
    %c0_i32_0 = arith.constant 0 : i32
    %c0_i32_1 = arith.constant 0 : i32
    return %c0_i32, %c0_i32_0 : i32, i32
  }
  func.func @transform_6(%arg0: i32) -> (i32, i32) {
    %c0_i32 = arith.constant 0 : i32
    %c0_i32_0 = arith.constant 0 : i32
    %c0_i32_1 = arith.constant 0 : i32
    return %c0_i32, %c0_i32_0 : i32, i32
  }
  func.func @transform_7(%arg0: i32) -> (i32, i32) {
    %c0_i32 = arith.constant 0 : i32
    %c0_i32_0 = arith.constant 0 : i32
    %c0_i32_1 = arith.constant 0 : i32
    return %c0_i32, %c0_i32_0 : i32, i32
  }
  func.func @transform_8(%arg0: i32) -> (i32, i32) {
    %c0_i32 = arith.constant 0 : i32
    %c0_i32_0 = arith.constant 0 : i32
    %c0_i32_1 = arith.constant 0 : i32
    return %c0_i32, %c0_i32_0 : i32, i32
  }
  func.func @transform_9(%arg0: i32) -> (i32, i32) {
    %c0_i32 = arith.constant 0 : i32
    %c0_i32_0 = arith.constant 0 : i32
    return %arg0, %c0_i32 : i32, i32
  }
}

</mosaic_0001>

<bundles_post_ra>
// kernel: tpu_custom_call.1
= control target key start
LH: loop header
LB: loop body
LE: loop exit
PB: predicated region body
PF: predicated region fallthrough
CT: control target
= control target key end

     0   :  { %14 = vsyncpa [#allocation3], 0  ;;  %s578_s0 = inlined_call_operand.vmem [shape: f32[8,256], index: 0, kind: input, shape index: {}]   ;;  %s579_s1 = inlined_call_operand.vmem [shape: f32[8,256], index: 1, kind: input, shape index: {}]   ;;  %s580_s2 = inlined_call_operand.hbm [shape: f32[8,256], index: 2, kind: input, shape index: {}]   ;;  %s581_s3 = inlined_call_operand.vmem [shape: f32[8,2], index: 3, kind: input, shape index: {}]   ;;  %s582_s4 = inlined_call_operand.vmem [shape: f32[8,2], index: 4, kind: input, shape index: {}]   ;;  %s583_s5 = inlined_call_operand.vmem [shape: f32[8,2], index: 5, kind: input, shape index: {}]   ;;  %s584_s6 = inlined_call_operand.vmem [shape: f32[2,3], index: 6, kind: input, shape index: {}]   ;;  %s585_s7 = inlined_call_operand.vmem [shape: f32[2,8], index: 7, kind: input, shape index: {}]   ;;  %s586_s8 = inlined_call_operand.vmem [shape: f32[8,2], index: 8, kind: input, shape index: {}]   ;;  %s587_s9 = inlined_call_operand.hbm [shape: f32[8,256], index: 9, kind: output, shape index: {}]  }
   0x1   :  { %15 = vsyncpa [#allocation4], 0  ;;  %s436_s30 = smov [#allocation2]   ;;  %s388_s13 = scalar_lea.hbm %s580_s2, 256 }
   0x2   :  { %s26_s10 = sshll.u32 %s436_s30, 4  ;;  %p389_p0 = scmp.ne.s32.totalorder %s580_s2, %s388_s13  ;;  %s27_s10 = int_to_ptr.vmem [resolvable:$true] %s26_s10 }
   0x3   :  { %p392_p1 = scmp.lt.u32.totalorder %s388_s13, %s580_s2 }
   0x5   :  { %p394_p2 = pnand %p392_p1, %p389_p0 }
   0x7   :  { %397 = shalt.err (!%p394_p2)
}
   0x8   :  { %s398_s18 = scalar_lea.vmem %s27_s10, 256  ;;  %p403_p4 = scmp.lt.s32.totalorder %s27_s10, %s27_s10 }
   0x9   :  { %p399_p3 = scmp.ne.s32.totalorder %s27_s10, %s398_s18  ;;  %p404_p5 = scmp.lt.s32.totalorder %s398_s18, %s398_s18 }
   0xb   :  { %p405_p6 = por %p404_p5, %p403_p4 }
   0xd   :  { %p406_p7 = pnand %p405_p6, %p399_p3 }
   0xf   :  { %409 = shalt.err (!%p406_p7)
}
  0x10   :  { %29 = dma.hbm_to_vmem [thread:$0]  %s580_s2, 256, %s27_s10, [#allocation3]  }
  0x11   :  { %432 = dma.done.wait [#allocation3], 256  }
  0x12   :  { %433 = vsyncadd [#allocation3], 4294967040  ;;  %v508_v0 = vld [vmem:[%s578_s0] sm:$0xff]  ;;  %v513_v1 = vld [vmem:[%s578_s0 + $0x8] sm:$0xff]  ;;  %v437_v9 = vmov 0.0   ;;  %vm438_vm0 = vmmov 0  }
  0x13   :  { %v518_v2 = vld [vmem:[%s579_s1] sm:$0xff]  ;;  %v47_v3 = vadd.f32 %v513_v1, %v508_v0  ;;  %v525_v4 = vld [vmem:[%s579_s1 + $0x8] sm:$0xff]  ;;  %358 = vmatprep.subr.mxu0 %v437_v9  ;;  %363 = vmatprep.subr.mxu1 %v437_v9  ;;  %vm69_vm1 = vcmask 64512   ;;  %vm149_vm2 = vcmask 1041408   ;;  %vm145_vm3 = vcmask 15360  }
  0x14   :  { %v527_v5 = vld [vmem:[#allocation2] sm:$0xff]  ;;  %v529_v6 = vld [vmem:[#allocation2 + $0x8] sm:$0xff]  ;;  %v52_v8 = vadd.f32 %v525_v4, %v518_v2  ;;  %360 = vmatprep.mubr.msk.f32.mxu0 %vm438_vm0, %v437_v9  ;;  %365 = vmatprep.mubr.msk.f32.mxu1 %vm438_vm0, %v437_v9  ;;  %v439_v26 = vmov 0   ;;  %v440_v34 = vmov 1   ;;  %v441_v37 = vmov 2  }
  0x15   :  { %v57_v7 = vadd.f32 %v529_v6, %v527_v5  ;;  %48 = vadd.xlane.f32.xlu0 %v47_v3  ;;  %v60_v11 = vld [vmem:[%s581_s3] sm:$0xff]  ;;  %380 = vset.pattern.permute.xlu1 %v439_v26 }
  0x16   :  { %v62_v12 = vld [vmem:[%s582_s4] sm:$0xff]  ;;  %381 = vset.pattern.permute.xlu0 %v440_v34 }
  0x17   :  { %58 = vadd.xlane.f32.xlu1 %v57_v7  ;;  %v65_v13 = vld [vmem:[%s583_s5] sm:$0xff] }
  0x18   :  { %v68_v21 = vld [vmem:[%s585_s7] sm:$0x3]  ;;  %s442_s7 = smov [#allocation5]  }
  0x19   :  { %53 = vadd.xlane.f32.xlu0 %v52_v8  ;;  %v144_v22 = vld [vmem:[%s584_s6] sm:$0x3] }
  0x1a   :  { %364 = vmatpush3.msk.msra.mxu1 %vm149_vm2, %v144_v22  ;;  %v229_v32 = vld [vmem:[%s586_s8] sm:$0xff]  ;;  %s337_s8 = sshll.u32 %s442_s7, 4  ;;  %s338_s8 = int_to_ptr.vmem [resolvable:$true] %s337_s8 }
  0x1b   :  { %s410_s13 = scalar_lea.vmem %s338_s8, 256  ;;  %p415_p9 = scmp.lt.s32.totalorder %s338_s8, %s338_s8 }
  0x1c   :  { %p411_p8 = scmp.ne.s32.totalorder %s338_s8, %s410_s13  ;;  %p416_p10 = scmp.lt.s32.totalorder %s410_s13, %s410_s13 }
  0x1e   :  { %p417_p11 = por %p416_p10, %p415_p9 }
  0x20   :  { %p418_p12 = pnand %p417_p11, %p411_p8 }
  0xa2   :  { %v49_v10 = vpop.xlane.xlu0 %48 }
  0xa3   :  { %v61_v16 = vmul.f32 %v60_v11, %v49_v10 }
  0xa4   :  { %v59_v14 = vpop.xlane.xlu1 %58 }
  0xa5   :  { %v66_v18 = vmul.f32 %v65_v13, %v59_v14 }
  0xa6   :  { %v54_v15 = vpop.xlane.xlu0 %53 }
  0xa7   :  { %v63_v17 = vmul.f32 %v62_v12, %v54_v15 }
  0xa9   :  { %v64_v19 = vadd.f32 %v63_v17, %v61_v16 }
  0xab   :  { %v67_v20 = vadd.f32 %v66_v18, %v64_v19 }
  0xad   :  { %359 = vmatpush3.msra.mxu0 %v67_v20 }
  0xae   :  { %361 = vmatmul.mubr.msk.f32.vlgmr.msra.gmra.mrb[0].mxu0 %vm69_vm1, %v68_v21  ;;  %368 = vmatprep.subr.mxu0 %v437_v9 }
  0xaf   :  { %370 = vmatprep.mubr.msk.f32.mxu0 %vm438_vm0, %v437_v9 }
 0x181   :  { %v139_v23 = vpop.f32.mrb[0].mxu0 }
 0x182   :  { %v143_v24 = vmax.f32 %v139_v23, 0.0  ;;  %v362_v25 = vpop.f32.mrb[1].mxu0 }
 0x184   :  { %366 = vmatmul.mubr.msk.f32.vlgmr.msra.gmra.mrb[0].mxu1 %vm145_vm3, %v143_v24 }
 0x257   :  { %v219_v27 = vpop.f32.mrb[0].mxu1 }
 0x258   :  { %v349_v28 = vmul.f32 -1.442695, %v219_v27  ;;  %v367_v29 = vpop.f32.mrb[1].mxu1 }
 0x25a   :  { %384 = vpow2.f32 %v349_v28 }
 0x264   :  { %v385_v30 = vpop.eup %384 }
 0x265   :  { %v226_v31 = vadd.f32 1.0, %v385_v30 }
 0x267   :  { %386 = vrcp.f32 %v226_v31 }
 0x271   :  { %v387_v33 = vpop.eup %386 }
 0x272   :  { %369 = vmatpush3.msk.msra.mxu0 %vm149_vm2, %v387_v33 }
 0x273   :  { %371 = vmatmul.mubr.msk.f32.vlgmr.msra.gmra.mrb[2].mxu0 %vm145_vm3, %v229_v32 }
 0x346   :  { %v302_v35 = vpop.f32.mrb[2].mxu0 }
 0x347   :  { %308 = vperm.xlu1 %380, %v302_v35   ;;  %v372_v36 = vpop.f32.mrb[3].mxu0  ;;  %314 = vperm.xlu0 %381, %v302_v35  }
 0x34b   :  { %382 = vset.pattern.permute.xlu1 %v441_v37  ;;  %383 = vset.pattern.permute.xlu0 %v441_v37 }
 0x34c   :  { %322 = vperm.xlu1 %382, %v302_v35  }
 0x3c6   :  { %v309_v38 = vpop.permute.xlu1 %308  ;;  %v315_v39 = vpop.permute.xlu0 %314 }
 0x3c7   :  { %v311_v40 = vmul.f32 %v309_v38, %v508_v0  ;;  %v312_v41 = vmul.f32 %v309_v38, %v513_v1  ;;  %v317_v42 = vmul.f32 %v315_v39, %v518_v2  ;;  %v318_v43 = vmul.f32 %v315_v39, %v525_v4 }
 0x3c9   :  { %v319_v45 = vadd.f32 %v317_v42, %v311_v40  ;;  %v320_v46 = vadd.f32 %v318_v43, %v312_v41 }
 0x3cb   :  { %v323_v44 = vpop.permute.xlu1 %322 }
 0x3cc   :  { %v325_v47 = vmul.f32 %v323_v44, %v527_v5  ;;  %v326_v48 = vmul.f32 %v323_v44, %v529_v6 }
 0x3ce   :  { %v327_v49 = vadd.f32 %v325_v47, %v319_v45  ;;  %v328_v50 = vadd.f32 %v326_v48, %v320_v46 }
 0x3d0   :  { %329 = vst [vmem:[#allocation5] sm:$0xff] %v327_v49  ;;  %330 = vst [vmem:[#allocation5 + $0x8] sm:$0xff] %v328_v50 }
 0x3d1   :  { %421 = shalt.err (!%p418_p12)
}
 0x3d2   :  { %s422_s16 = scalar_lea.hbm %s587_s9, 256 }
 0x3d3   :  { %p423_p13 = scmp.ne.s32.totalorder %s587_s9, %s422_s16  ;;  %p426_p0 = scmp.lt.u32.totalorder %s422_s16, %s587_s9 }
 0x3d5   :  { %p428_p1 = pnand %p426_p0, %p423_p13 }
 0x3d7   :  { %431 = shalt.err (!%p428_p1)
}
 0x3d8   :  { %340 = dma.vmem_to_hbm [thread:$0]  %s338_s8, 256, %s587_s9, [#allocation4]  }
 0x3d9   :  { %434 = dma.done.wait [#allocation4], 256  }
 0x3da   :  { %435 = vsyncadd [#allocation4], 4294967040 }
 0x3db   :  { %344 = vsyncpa [#allocation3], 1 }
 0x3dc   :  { %345 = vsyncpa [#allocation4], 1 }

</bundles_post_ra>
